<compile_context>
chip_gen: v6e
topology: v6e:2x2x1
jax: 0.10.0
libtpu: 0.0.40
codegen_flags: <defaults>
</compile_context>

<pallas_src>
import functools

import jax
import jax.numpy as jnp
from jax.experimental import pallas as pl
from jax.experimental.pallas import tpu as pltpu

OUT_DIMS = (11, 6, 14, 5, 4, 3)   # face, mouth, eyebrow, eye, nose, jaw
HIDDEN = 128                      # per-branch hidden width (exact spec)
OUT_PAD = 128                     # 43 total logits padded to one lane group
C_MID = 128                       # synthetic backbone width (lane-dense)


def _round_up(x, m):
    return ((x + m - 1) // m) * m


def _pick_row_tile(hw, max_tile=1024):
    """Largest divisor of hw that is a multiple of 8 and <= max_tile.

    max_tile=1024 keeps the double-buffered patch tile far below the v7x
    64 MiB VMEM ceiling even for wide Cin.
    """
    best = None
    for t in range(8, min(hw, max_tile) + 1, 8):
        if hw % t == 0:
            best = t
    return best if best is not None else hw


def multitask_kernel(patches_ref, wconv_ref, bconv_ref, wfc_ref, bfc_ref,
                     w1_ref, b1_ref, w2_ref, b2_ref, out_ref, pooled_acc,
                     *, inv_hw):
    """grid = (batch, spatial row tiles).

    The backbone conv runs per tile; the global-average-pool accumulates into
    VMEM scratch; the backbone fc + 6-branch head runs once per image on the
    last tile of that image.
    """
    t = pl.program_id(1)

    # conv3x3 as im2col matmul on this row tile (bf16 MXU, f32 accumulate).
    conv = jnp.dot(patches_ref[...], wconv_ref[...],
                   preferred_element_type=jnp.float32) + bconv_ref[...]
    conv = jnp.maximum(conv, 0.0)                       # ReLU in f32

    @pl.when(t == 0)
    def _():
        pooled_acc[...] = jnp.zeros_like(pooled_acc)

    # per-image global average pool: accumulate sublane partial sums.
    pooled_acc[...] += jnp.sum(conv, axis=0, keepdims=True)

    @pl.when(t == pl.num_programs(1) - 1)
    def _():
        pooled = pooled_acc[...] * inv_hw                       # (1, C_MID) f32
        # backbone fc: (1, C_MID) @ (C_MID, E)
        emb = jnp.dot(pooled.astype(jnp.bfloat16), wfc_ref[...],
                      preferred_element_type=jnp.float32) + bfc_ref[...]
        # multi-task head: all 6 branches' first Linear stacked -> (1, 6*128)
        h = jnp.dot(emb.astype(jnp.bfloat16), w1_ref[...],
                    preferred_element_type=jnp.float32) + b1_ref[...]
        h = jnp.maximum(h, 0.0)                                 # ReLU(True)
        # block-diagonal second Linear -> (1, OUT_PAD); pad columns stay zero
        # because the pad region of w2/b2 is zero-initialized.
        logits = jnp.dot(h.astype(jnp.bfloat16), w2_ref[...],
                         preferred_element_type=jnp.float32) + b2_ref[...]
        out_ref[...] = logits.reshape(out_ref.shape)


def im2col_3x3(x_nhwc):
    """3x3, stride 1, padding 1 patch extraction -> (N*H*W, 9*C)."""
    n, h, w, c = x_nhwc.shape
    xp = jnp.pad(x_nhwc, ((0, 0), (1, 1), (1, 1), (0, 0)))
    cols = []
    for dy in range(3):
        for dx in range(3):
            cols.append(xp[:, dy:dy + h, dx:dx + w, :])
    patches = jnp.concatenate(cols, axis=-1)    # (N, H, W, 9*C)
    return patches.reshape(n * h * w, 9 * c)


def init_params(key, c_in, c_mid, num_embeddings):
    ks = jax.random.split(key, 16)
    e = num_embeddings

    def lin(k, fan_in, shape):
        return jax.random.normal(k, shape, jnp.float32) / jnp.sqrt(float(fan_in))

    p = {}
    # synthetic backbone (stand-in for the pretrained model head)
    p["wconv"] = lin(ks[0], 9 * c_in, (9 * c_in, c_mid))
    p["bconv"] = jnp.zeros((1, c_mid), jnp.float32)
    p["wfc"] = lin(ks[1], c_mid, (c_mid, e))
    p["bfc"] = jnp.zeros((1, e), jnp.float32)

    # 6 branches: Linear(E,128) -> ReLU -> Linear(128, n_j) fused as a stacked
    # w1 (E, 6*128) and a block-diagonal w2 (6*128, OUT_PAD).
    # NOTE: the pad region of w2/b2 (columns >= sum(OUT_DIMS)) must stay
    # exactly zero; if real checkpoint weights are loaded later, re-zero it.
    w1_list, b1_list = [], []
    w2_big = jnp.zeros((6 * HIDDEN, OUT_PAD), jnp.float32)
    b2_big = jnp.zeros((1, OUT_PAD), jnp.float32)
    col = 0
    for j, d in enumerate(OUT_DIMS):
        w1_list.append(lin(ks[2 + 2 * j], e, (e, HIDDEN)))
        b1_list.append(jnp.full((HIDDEN,), 0.01 * (j + 1), jnp.float32))
        w2_j = lin(ks[3 + 2 * j], HIDDEN, (HIDDEN, d))
        w2_big = w2_big.at[j * HIDDEN:(j + 1) * HIDDEN, col:col + d].set(w2_j)
        b2_big = b2_big.at[0, col:col + d].set(0.02 * (j + 1))
        col += d
    p["w1"] = jnp.concatenate(w1_list, axis=1)          # (E, 6*128)
    p["b1"] = jnp.concatenate(b1_list)[None, :]          # (1, 6*128)
    p["w2"] = w2_big                                     # (6*128, OUT_PAD)
    p["b2"] = b2_big                                     # (1, OUT_PAD)
    return p


@functools.partial(jax.jit, static_argnames=("row_tile",))
def multitask_forward(x_nchw, params, row_tile=None):
    n, c, h, w = x_nchw.shape
    hw = h * w
    if row_tile is None:
        row_tile = _pick_row_tile(hw)
    assert hw % row_tile == 0 and row_tile % 8 == 0, (hw, row_tile)
    tiles_per_image = hw // row_tile

    c_mid = params["wconv"].shape[1]
    e = params["wfc"].shape[1]
    k_raw = params["wconv"].shape[0]                 # 9 * c_in
    kpad = _round_up(k_raw, 8)

    # im2col + sublane padding of K; bf16 MXU operands (f32 accumulate).
    x_nhwc = jnp.transpose(x_nchw, (0, 2, 3, 1)).astype(jnp.float32)
    patches = im2col_3x3(x_nhwc)                                 # (n*hw, 9c)
    patches = jnp.pad(patches, ((0, 0), (0, kpad - k_raw))).astype(jnp.bfloat16)

    wconv = jnp.pad(params["wconv"],
                    ((0, kpad - k_raw), (0, 0))).astype(jnp.bfloat16)
    wfc = params["wfc"].astype(jnp.bfloat16)
    w1 = params["w1"].astype(jnp.bfloat16)
    w2 = params["w2"].astype(jnp.bfloat16)
    bconv, bfc, b1, b2 = (params["bconv"], params["bfc"],
                          params["b1"], params["b2"])            # stay f32

    const = lambda b, t: (0, 0)   # weights: VMEM-resident across grid steps
    grid_spec = pltpu.PrefetchScalarGridSpec(
        num_scalar_prefetch=0,
        grid=(n, tiles_per_image),
        in_specs=[
            pl.BlockSpec((row_tile, kpad),
                         lambda b, t: (b * tiles_per_image + t, 0)),
            pl.BlockSpec((kpad, c_mid), const),
            pl.BlockSpec((1, c_mid), const),
            pl.BlockSpec((c_mid, e), const),
            pl.BlockSpec((1, e), const),
            pl.BlockSpec((e, 6 * HIDDEN), const),
            pl.BlockSpec((1, 6 * HIDDEN), const),
            pl.BlockSpec((6 * HIDDEN, OUT_PAD), const),
            pl.BlockSpec((1, OUT_PAD), const),
        ],
        out_specs=pl.BlockSpec((1, 1, OUT_PAD), lambda b, t: (b, 0, 0)),
        scratch_shapes=[pltpu.VMEM((1, c_mid), jnp.float32)],
    )

    flops = 2 * (n * hw * kpad * c_mid
                 + n * c_mid * e
                 + n * e * 6 * HIDDEN
                 + n * 6 * HIDDEN * OUT_PAD)
    bytes_accessed = (
        n * hw * kpad * 2                               # patches (bf16)
        + (kpad * c_mid + c_mid * e + e * 6 * HIDDEN
           + 6 * HIDDEN * OUT_PAD) * 2                  # weights (bf16)
        + (c_mid + e + 6 * HIDDEN + OUT_PAD) * 4        # biases (f32)
        + n * OUT_PAD * 4)                              # output (f32)
    cost = pl.CostEstimate(flops=flops, transcendentals=0,
                           bytes_accessed=bytes_accessed)

    out = pl.pallas_call(
        functools.partial(multitask_kernel, inv_hw=1.0 / float(hw)),
        out_shape=jax.ShapeDtypeStruct((n, 1, OUT_PAD), jnp.float32),
        grid_spec=grid_spec,
        compiler_params=pltpu.CompilerParams(
            dimension_semantics=("parallel", "arbitrary"),
            vmem_limit_bytes=32 * 1024 * 1024,   # safe on v5e/v6e and v7x (64 MiB)
        ),
        cost_estimate=cost,
    )(patches, wconv, bconv, wfc, bfc, w1, b1, w2, b2)

    out = out.reshape(n, OUT_PAD)
    # slice the fused padded output back into the six branch logits
    results, col = [], 0
    for d in OUT_DIMS:
        results.append(out[:, col:col + d])
        col += d
    return tuple(results)


def reference_forward(x_nchw, params):
    """Pure-JAX reference mirroring the kernel numerics (bf16 MXU operands)."""
    n, c, h, w = x_nchw.shape
    x_nhwc = jnp.transpose(x_nchw, (0, 2, 3, 1)).astype(jnp.float32)
    patches = im2col_3x3(x_nhwc).astype(jnp.bfloat16)
    conv = jnp.dot(patches, params["wconv"].astype(jnp.bfloat16),
                   preferred_element_type=jnp.float32) + params["bconv"]
    conv = jnp.maximum(conv, 0.0)
    pooled = conv.reshape(n, h * w, -1).mean(axis=1)
    emb = jnp.dot(pooled.astype(jnp.bfloat16),
                  params["wfc"].astype(jnp.bfloat16),
                  preferred_element_type=jnp.float32) + params["bfc"]
    hdn = jnp.maximum(
        jnp.dot(emb.astype(jnp.bfloat16), params["w1"].astype(jnp.bfloat16),
                preferred_element_type=jnp.float32) + params["b1"], 0.0)
    out = jnp.dot(hdn.astype(jnp.bfloat16), params["w2"].astype(jnp.bfloat16),
                  preferred_element_type=jnp.float32) + params["b2"]
    results, col = [], 0
    for d in OUT_DIMS:
        results.append(out[:, col:col + d])
        col += d
    return tuple(results)


if __name__ == "__main__":
    key = jax.random.PRNGKey(0)
    k_x, k_p = jax.random.split(key)

    N, C_IN, H, W = 2, 3, 16, 16
    NUM_EMBEDDINGS = 32

    x = jax.random.normal(k_x, (N, C_IN, H, W), jnp.float32)
    params = init_params(k_p, C_IN, C_MID, NUM_EMBEDDINGS)

    # row_tile=64 -> 4 spatial tiles per image, exercising the gridded
    # pool-accumulation path even at this small demo shape.
    outs = multitask_forward(x, params, row_tile=64)
    outs = jax.block_until_ready(outs)

    expected = [(N, d) for d in OUT_DIMS]
    assert [o.shape for o in outs] == expected, [o.shape for o in outs]
    assert all(jnp.all(jnp.isfinite(o)) for o in outs)

    refs = reference_forward(x, params)
    for o, r in zip(outs, refs):
        assert jnp.allclose(o, r, rtol=5e-2, atol=5e-2), (
            float(jnp.max(jnp.abs(o - r))))

    print("KERNEL_OK")
</pallas_src>

<mosaic_0001>
module attributes {stable_mosaic.version = 11 : i64} {
  func.func @multitask_kernel(%arg0: i32, %arg1: i32, %arg2: memref<64x32xbf16, #tpu.memory_space<vmem>>, %arg3: memref<32x128xbf16, #tpu.memory_space<vmem>>, %arg4: memref<1x128xf32, #tpu.memory_space<vmem>>, %arg5: memref<128x32xbf16, #tpu.memory_space<vmem>>, %arg6: memref<1x32xf32, #tpu.memory_space<vmem>>, %arg7: memref<32x768xbf16, #tpu.memory_space<vmem>>, %arg8: memref<1x768xf32, #tpu.memory_space<vmem>>, %arg9: memref<768x128xbf16, #tpu.memory_space<vmem>>, %arg10: memref<1x128xf32, #tpu.memory_space<vmem>>, %arg11: memref<1x1x128xf32, #tpu.memory_space<vmem>>, %arg12: memref<1x128xf32, #tpu.memory_space<vmem>>) attributes {dimension_semantics = [#tpu.dimension_semantics<parallel>, #tpu.dimension_semantics<arbitrary>], iteration_bounds = array<i64: 2, 4>, scalar_prefetch = 0 : i64, scratch_operands = 1 : i64, tpu.core_type = #tpu.core_type<tc>, window_params = [{transform_indices = @transform_0, window_bounds = array<i64: 64, 32>}, {pipeline_mode = #tpu.pipeline_mode<synchronous>, transform_indices = @transform_1, window_bounds = array<i64: 32, 128>}, {pipeline_mode = #tpu.pipeline_mode<synchronous>, transform_indices = @transform_2, window_bounds = array<i64: 1, 128>}, {pipeline_mode = #tpu.pipeline_mode<synchronous>, transform_indices = @transform_3, window_bounds = array<i64: 128, 32>}, {pipeline_mode = #tpu.pipeline_mode<synchronous>, transform_indices = @transform_4, window_bounds = array<i64: 1, 32>}, {pipeline_mode = #tpu.pipeline_mode<synchronous>, transform_indices = @transform_5, window_bounds = array<i64: 32, 768>}, {pipeline_mode = #tpu.pipeline_mode<synchronous>, transform_indices = @transform_6, window_bounds = array<i64: 1, 768>}, {pipeline_mode = #tpu.pipeline_mode<synchronous>, transform_indices = @transform_7, window_bounds = array<i64: 768, 128>}, {pipeline_mode = #tpu.pipeline_mode<synchronous>, transform_indices = @transform_8, window_bounds = array<i64: 1, 128>}, {transform_indices = @transform_9, window_bounds = array<i64: 1, 1, 128>}]} {
    %c0 = arith.constant 0 : index
    %c0_0 = arith.constant 0 : index
    %0 = vector.load %arg2[%c0, %c0_0] : memref<64x32xbf16, #tpu.memory_space<vmem>>, vector<64x32xbf16>
    %c0_1 = arith.constant 0 : index
    %c0_2 = arith.constant 0 : index
    %1 = vector.load %arg3[%c0_1, %c0_2] : memref<32x128xbf16, #tpu.memory_space<vmem>>, vector<32x128xbf16>
    %cst = arith.constant dense<0.000000e+00> : vector<64x128xf32>
    %2 = tpu.matmul %0, %1, %cst {dimension_numbers = #tpu.dot_dimension_numbers<[1], [0], [0], [1], [0, 0, 1, 1], [], []>} : vector<64x32xbf16>, vector<32x128xbf16>, vector<64x128xf32> -> vector<64x128xf32>
    %c0_3 = arith.constant 0 : index
    %c0_4 = arith.constant 0 : index
    %3 = vector.load %arg4[%c0_3, %c0_4] : memref<1x128xf32, #tpu.memory_space<vmem>>, vector<1x128xf32>
    %4 = vector.broadcast %3 : vector<1x128xf32> to vector<64x128xf32>
    %5 = arith.addf %2, %4 : vector<64x128xf32>
    %cst_5 = arith.constant 0.000000e+00 : f32
    %6 = vector.broadcast %cst_5 : f32 to vector<64x128xf32>
    %7 = arith.maximumf %5, %6 : vector<64x128xf32>
    %c0_i32 = arith.constant 0 : i32
    %8 = arith.cmpi eq, %arg1, %c0_i32 : i32
    %9 = arith.extui %8 : i1 to i32
    %c0_i32_6 = arith.constant 0 : i32
    %10 = arith.cmpi ne, %9, %c0_i32_6 : i32
    scf.if %10 {
      %cst_13 = arith.constant 0.000000e+00 : f32
      %19 = vector.broadcast %cst_13 : f32 to vector<1x128xf32>
      %c0_14 = arith.constant 0 : index
      %c0_15 = arith.constant 0 : index
      %20 = vector.load %arg12[%c0_14, %c0_15] : memref<1x128xf32, #tpu.memory_space<vmem>>, vector<1x128xf32>
      tpu.vector_store %arg12[%c0_14, %c0_15], %19 {strides = array<i32>} : memref<1x128xf32, #tpu.memory_space<vmem>>, vector<1x128xf32>,
    } else {
    }
    %c0_7 = arith.constant 0 : index
    %c0_8 = arith.constant 0 : index
    %11 = vector.load %arg12[%c0_7, %c0_8] : memref<1x128xf32, #tpu.memory_space<vmem>>, vector<1x128xf32>
    %cst_9 = arith.constant dense<0.000000e+00> : vector<128xf32>
    %12 = vector.multi_reduction <add>, %7, %cst_9 [0] : vector<64x128xf32> to vector<128xf32>
    %13 = vector.shape_cast %12 : vector<128xf32> to vector<1x128xf32>
    %14 = arith.addf %11, %13 : vector<1x128xf32>
    %c0_10 = arith.constant 0 : index
    %c0_11 = arith.constant 0 : index
    %15 = vector.load %arg12[%c0_10, %c0_11] : memref<1x128xf32, #tpu.memory_space<vmem>>, vector<1x128xf32>
    tpu.vector_store %arg12[%c0_10, %c0_11], %14 {strides = array<i32>} : memref<1x128xf32, #tpu.memory_space<vmem>>, vector<1x128xf32>,
    %c3_i32 = arith.constant 3 : i32
    %16 = arith.cmpi eq, %arg1, %c3_i32 : i32
    %17 = arith.extui %16 : i1 to i32
    %c0_i32_12 = arith.constant 0 : i32
    %18 = arith.cmpi ne, %17, %c0_i32_12 : i32
    scf.if %18 {
      %c0_13 = arith.constant 0 : index
      %c0_14 = arith.constant 0 : index
      %19 = vector.load %arg12[%c0_13, %c0_14] : memref<1x128xf32, #tpu.memory_space<vmem>>, vector<1x128xf32>
      %cst_15 = arith.constant 3.906250e-03 : f32
      %20 = vector.broadcast %cst_15 : f32 to vector<1x128xf32>
      %21 = arith.mulf %19, %20 : vector<1x128xf32>
      %22 = arith.truncf %21 : vector<1x128xf32> to vector<1x128xbf16>
      %c0_16 = arith.constant 0 : index
      %c0_17 = arith.constant 0 : index
      %23 = vector.load %arg5[%c0_16, %c0_17] : memref<128x32xbf16, #tpu.memory_space<vmem>>, vector<128x32xbf16>
      %cst_18 = arith.constant dense<0.000000e+00> : vector<1x32xf32>
      %24 = tpu.matmul %22, %23, %cst_18 {dimension_numbers = #tpu.dot_dimension_numbers<[1], [0], [0], [1], [0, 0, 1, 1], [], []>} : vector<1x128xbf16>, vector<128x32xbf16>, vector<1x32xf32> -> vector<1x32xf32>
      %c0_19 = arith.constant 0 : index
      %c0_20 = arith.constant 0 : index
      %25 = vector.load %arg6[%c0_19, %c0_20] : memref<1x32xf32, #tpu.memory_space<vmem>>, vector<1x32xf32>
      %26 = arith.addf %24, %25 : vector<1x32xf32>
      %27 = arith.truncf %26 : vector<1x32xf32> to vector<1x32xbf16>
      %c0_21 = arith.constant 0 : index
      %c0_22 = arith.constant 0 : index
      %28 = vector.load %arg7[%c0_21, %c0_22] : memref<32x768xbf16, #tpu.memory_space<vmem>>, vector<32x768xbf16>
      %cst_23 = arith.constant dense<0.000000e+00> : vector<1x768xf32>
      %29 = tpu.matmul %27, %28, %cst_23 {dimension_numbers = #tpu.dot_dimension_numbers<[1], [0], [0], [1], [0, 0, 1, 1], [], []>} : vector<1x32xbf16>, vector<32x768xbf16>, vector<1x768xf32> -> vector<1x768xf32>
      %c0_24 = arith.constant 0 : index
      %c0_25 = arith.constant 0 : index
      %30 = vector.load %arg8[%c0_24, %c0_25] : memref<1x768xf32, #tpu.memory_space<vmem>>, vector<1x768xf32>
      %31 = arith.addf %29, %30 : vector<1x768xf32>
      %cst_26 = arith.constant 0.000000e+00 : f32
      %32 = vector.broadcast %cst_26 : f32 to vector<1x768xf32>
      %33 = arith.maximumf %31, %32 : vector<1x768xf32>
      %34 = arith.truncf %33 : vector<1x768xf32> to vector<1x768xbf16>
      %c0_27 = arith.constant 0 : index
      %c0_28 = arith.constant 0 : index
      %35 = vector.load %arg9[%c0_27, %c0_28] : memref<768x128xbf16, #tpu.memory_space<vmem>>, vector<768x128xbf16>
      %cst_29 = arith.constant dense<0.000000e+00> : vector<1x128xf32>
      %36 = tpu.matmul %34, %35, %cst_29 {dimension_numbers = #tpu.dot_dimension_numbers<[1], [0], [0], [1], [0, 0, 1, 1], [], []>} : vector<1x768xbf16>, vector<768x128xbf16>, vector<1x128xf32> -> vector<1x128xf32>
      %c0_30 = arith.constant 0 : index
      %c0_31 = arith.constant 0 : index
      %37 = vector.load %arg10[%c0_30, %c0_31] : memref<1x128xf32, #tpu.memory_space<vmem>>, vector<1x128xf32>
      %38 = arith.addf %36, %37 : vector<1x128xf32>
      %39 = vector.shape_cast %38 : vector<1x128xf32> to vector<1x1x128xf32>
      %c0_32 = arith.constant 0 : index
      %c0_33 = arith.constant 0 : index
      %c0_34 = arith.constant 0 : index
      %40 = vector.load %arg11[%c0_32, %c0_33, %c0_34] : memref<1x1x128xf32, #tpu.memory_space<vmem>>, vector<1x1x128xf32>
      tpu.vector_store %arg11[%c0_32, %c0_33, %c0_34], %39 {strides = array<i32>} : memref<1x1x128xf32, #tpu.memory_space<vmem>>, vector<1x1x128xf32>,
    } else {
    }
    return
  }
  func.func @transform_0(%arg0: i32, %arg1: i32) -> (i32, i32) {
    %c4_i32 = arith.constant 4 : i32
    %0 = arith.muli %arg0, %c4_i32 : i32
    %1 = arith.addi %0, %arg1 : i32
    %c0_i32 = arith.constant 0 : i32
    %c0_i32_0 = arith.constant 0 : i32
    return %1, %c0_i32 : i32, i32
  }
  func.func @transform_1(%arg0: i32, %arg1: i32) -> (i32, i32) {
    %c0_i32 = arith.constant 0 : i32
    %c0_i32_0 = arith.constant 0 : i32
    %c0_i32_1 = arith.constant 0 : i32
    return %c0_i32, %c0_i32_0 : i32, i32
  }
  func.func @transform_2(%arg0: i32, %arg1: i32) -> (i32, i32) {
    %c0_i32 = arith.constant 0 : i32
    %c0_i32_0 = arith.constant 0 : i32
    %c0_i32_1 = arith.constant 0 : i32
    return %c0_i32, %c0_i32_0 : i32, i32
  }
  func.func @transform_3(%arg0: i32, %arg1: i32) -> (i32, i32) {
    %c0_i32 = arith.constant 0 : i32
    %c0_i32_0 = arith.constant 0 : i32
    %c0_i32_1 = arith.constant 0 : i32
    return %c0_i32, %c0_i32_0 : i32, i32
  }
  func.func @transform_4(%arg0: i32, %arg1: i32) -> (i32, i32) {
    %c0_i32 = arith.constant 0 : i32
    %c0_i32_0 = arith.constant 0 : i32
    %c0_i32_1 = arith.constant 0 : i32
    return %c0_i32, %c0_i32_0 : i32, i32
  }
  func.func @transform_5(%arg0: i32, %arg1: i32) -> (i32, i32) {
    %c0_i32 = arith.constant 0 : i32
    %c0_i32_0 = arith.constant 0 : i32
    %c0_i32_1 = arith.constant 0 : i32
    return %c0_i32, %c0_i32_0 : i32, i32
  }
  func.func @transform_6(%arg0: i32, %arg1: i32) -> (i32, i32) {
    %c0_i32 = arith.constant 0 : i32
    %c0_i32_0 = arith.constant 0 : i32
    %c0_i32_1 = arith.constant 0 : i32
    return %c0_i32, %c0_i32_0 : i32, i32
  }
  func.func @transform_7(%arg0: i32, %arg1: i32) -> (i32, i32) {
    %c0_i32 = arith.constant 0 : i32
    %c0_i32_0 = arith.constant 0 : i32
    %c0_i32_1 = arith.constant 0 : i32
    return %c0_i32, %c0_i32_0 : i32, i32
  }
  func.func @transform_8(%arg0: i32, %arg1: i32) -> (i32, i32) {
    %c0_i32 = arith.constant 0 : i32
    %c0_i32_0 = arith.constant 0 : i32
    %c0_i32_1 = arith.constant 0 : i32
    return %c0_i32, %c0_i32_0 : i32, i32
  }
  func.func @transform_9(%arg0: i32, %arg1: i32) -> (i32, i32, i32) {
    %c0_i32 = arith.constant 0 : i32
    %c0_i32_0 = arith.constant 0 : i32
    %c0_i32_1 = arith.constant 0 : i32
    return %arg0, %c0_i32, %c0_i32_0 : i32, i32, i32
  }
}

</mosaic_0001>

<bundles_post_ra>
// kernel: multitask_forward.1
= control target key start
LH: loop header
LB: loop body
LE: loop exit
PB: predicated region body
PF: predicated region fallthrough
CT: control target
= control target key end

     0   :  { %s1866_s30 = smov 0   ;;  %s1868_s10 = smov 0   ;;  %s2167_s0 = inlined_call_operand.vmem [shape: bf16[512,32], index: 0, kind: input, shape index: {}]   ;;  %s2168_s1 = inlined_call_operand.vmem [shape: bf16[32,128], index: 1, kind: input, shape index: {}]   ;;  %s2169_s2 = inlined_call_operand.vmem [shape: f32[1,128], index: 2, kind: input, shape index: {}]   ;;  %s2170_s3 = inlined_call_operand.vmem [shape: bf16[128,32], index: 3, kind: input, shape index: {}]   ;;  %s2171_s4 = inlined_call_operand.vmem [shape: f32[1,32], index: 4, kind: input, shape index: {}]   ;;  %s2172_s5 = inlined_call_operand.vmem [shape: bf16[32,768], index: 5, kind: input, shape index: {}]   ;;  %s2173_s6 = inlined_call_operand.vmem [shape: f32[1,768], index: 6, kind: input, shape index: {}]   ;;  %s2174_s7 = inlined_call_operand.vmem [shape: bf16[768,128], index: 7, kind: input, shape index: {}]   ;;  %s2175_s8 = inlined_call_operand.vmem [shape: f32[1,128], index: 8, kind: input, shape index: {}]   ;;  %s2176_s9 = inlined_call_operand.vmem [shape: f32[2,1,128], index: 9, kind: output, shape index: {}]  }
   0x1   :  { %s1870_s11 = smov 0   ;;  %s1872_s12 = smov 0  }
   0x2   :  { %s1874_s13 = smov 0  }
   0x3 LB: > { %s28_s14 = sadd.s32 1, %s1802_s11  ;;  %s31_s15 = sadd.s32 1, %s1806_s12  ;;  %s1810_s13 = sphi %s1874_s13, %s19_s13   ;;  %s1806_s12 = sphi %s1872_s12, %s2180_s12   ;;  %s1802_s11 = sphi %s1870_s11, %s2179_s11   ;;  %s1798_s10 = sphi %s1868_s10, %s2178_s10   ;;  %s1794_s30 = sphi %s1866_s30, %s2177_s30  }
   0x4   : > { %p29_p0 = scmp.ge.s32.totalorder %s28_s14, 4  ;;  %p1441_p1 = scmp.ge.s32.totalorder %s1810_s13, 1 }
   0x5   : > { %p308_p2 = scmp.lt.s32.totalorder %s1810_s13, 9 }
   0x6   : > { %s2182_s14 = smov (%p29_p0, %s28_s14), 0  ;;  %s2184_s15 = smov (!%p29_p0, %s31_s15), %s1806_s12 }
   0x7   : > { %p309_p3 = pnand %p1441_p1, %p308_p2  ;;  %p33_p4 = scmp.ge.s32.totalorder %s2184_s15, 2 }
   0x8   : > { %p354_p5 = scmp.lt.s32.totalorder (!%p309_p3), %s1798_s10, 1  ;;  %s1442_s20 = sshll.u32 (!%p309_p3), %s1798_s10, 2 }
   0x9   : > { %s2186_s15 = smov (%p33_p4, %s2184_s15), 0  ;;  %312 = sbr.rel (%p309_p3) target bundleno = 920 (0x398), region = 56 }
   0xa   : > { %s345_s21 = sadd.s32 (!%p309_p3), %s1794_s30, %s1442_s20  ;;  %p1456_p7 = scmp.ne.s32.totalorder (!%p309_p3), %s1794_s30, 0 }
   0xb   : > { %s1443_s25 = sshll.u32 (!%p309_p3), %s345_s21, 3 }
   0xc   : > { %p347_p6 = scmp.lt.s32.totalorder (!%p309_p3), %s1443_s25, 63 }
   0xe   : > { %v1692_v0 = vld [vmem:[%s2168_s1 + $0x8] sm:$0xff]   ;;  %v1693_v1 = vld [vmem:[%s2168_s1] sm:$0xff]   ;;  %s2188_s10 = smov (!%p354_p5, %s1798_s10), 1  ;;  %s2190_s25 = smov (!%p347_p6, %s1443_s25), 63  ;;  %vm409_vm0 = vcmask 261120  }
   0xf   : > { %1612 = vmatprep.subr.bf16.mxu0 %v1692_v0  ;;  %1644 = vmatprep.subr.bf16.mxu1 %v1692_v0  ;;  %s356_s24 = scalar_lea.vmem %s2176_s9, %s2188_s10  ;;  %s1444_s26 = sshll.u32 %s2190_s25, 2  ;;  %v1445_v6 = vld [vmem:[%s2169_s2] ss:$0 sm:$0xff] }
  0x10   : > { %1613 = vmatpush3.bf16.msra.mxu0 %v1692_v0  ;;  %1646 = vmatpush3.bf16.msra.mxu1 %v1692_v0  ;;  %s350_s29 = scalar_lea.vmem %s2167_s0, %s1444_s26 }
  0x11   : > { %1614 = vmatprep.subr.bf16.mxu0 %v1693_v1  ;;  %1645 = vmatprep.subr.bf16.mxu1 %v1693_v1  ;;  %v1694_v2 = vld [vmem:[%s350_s29] sm:$0xff]   ;;  %v1695_v3 = vld [vmem:[%s350_s29 + $0x10] sm:$0xff]   ;;  %v1696_v4 = vld [vmem:[%s350_s29 + $0x8] sm:$0xff]  }
  0x12   : > { %1616 = vmatprep.mubr.msk.bf16.mxu0 %vm409_vm0, %v1694_v2  ;;  %1620 = vmatprep.mubr.msk.bf16.mxu1 %vm409_vm0, %v1695_v3  ;;  %v1697_v5 = vld [vmem:[%s350_s29 + $0x18] sm:$0xff]  }
  0x14   : > { %1615 = vmatpush3.bf16.msra.mxu0 %v1693_v1  ;;  %1647 = vmatpush3.bf16.msra.mxu1 %v1693_v1 }
  0x17   : > { %1617 = vmatmul.mubr.msk.bf16.vlgmr.msra.gmra.mxu0 %vm409_vm0, %v1696_v4  ;;  %1621 = vmatmul.mubr.msk.bf16.vlgmr.msra.gmra.mxu1 %vm409_vm0, %v1697_v5 }
  0xd7   : > { %v1618_v7 = vpop.f32.mrf.mxu0  ;;  %v1622_v9 = vpop.f32.mrf.mxu1 }
  0xd8   : > { %v465_v8 = vadd.f32 %v1618_v7, %v1445_v6  ;;  %v481_v10 = vadd.f32 %v1622_v9, %v1445_v6 }
  0xd9   : > { %v456_v11 = vpop.f32.mrf.mxu0  ;;  %v472_v14 = vpop.f32.mrf.mxu1 }
  0xda   : > { %v489_v12 = vmax.f32 %v465_v8, 0.0  ;;  %v457_v13 = vadd.f32 %v1445_v6, %v456_v11  ;;  %v493_v15 = vmax.f32 %v481_v10, 0.0  ;;  %v473_v16 = vadd.f32 %v1445_v6, %v472_v14 }
  0xdb   : > { %v1619_v17 = vpop.f32.mrf.mxu0  ;;  %v1623_v20 = vpop.f32.mrf.mxu1 }
  0xdc   : > { %v487_v18 = vmax.f32 %v457_v13, 0.0  ;;  %v468_v19 = vadd.f32 %v1619_v17, %v1445_v6  ;;  %v491_v21 = vmax.f32 %v473_v16, 0.0  ;;  %v484_v22 = vadd.f32 %v1623_v20, %v1445_v6  ;;  %498 = sbr.rel (%p1456_p7) target bundleno = 227 (0xe3), region = 60 }
  0xdd   : > { %v459_v23 = vpop.f32.mrf.mxu0  ;;  %v475_v26 = vpop.f32.mrf.mxu1 }
  0xde   : > { %v490_v24 = vmax.f32 %v468_v19, 0.0  ;;  %v460_v25 = vadd.f32 %v1445_v6, %v459_v23  ;;  %v494_v27 = vmax.f32 %v484_v22, 0.0  ;;  %v476_v28 = vadd.f32 %v1445_v6, %v475_v26 }
  0xe0   : > { %v488_v29 = vmax.f32 %v460_v25, 0.0  ;;  %v492_v30 = vmax.f32 %v476_v28, 0.0 }
  0xe1   : > { %v1812_v31 = vmov 0.0  }
  0xe2   : > { %499 = vst [vmem:[#allocation2] sm:$0x1] %v1812_v31 }
  0xe3 PF: > { %v501_v32 = vadd.f32 %v488_v29, %v487_v18  ;;  %p1457_p8 = scmp.ne.s32.totalorder %s1794_s30, 3 }
  0xe5   : > { %v502_v33 = vadd.f32 %v501_v32, %v489_v12 }
  0xe7   : > { %v503_v34 = vadd.f32 %v502_v33, %v490_v24 }
  0xe9   : > { %v504_v35 = vadd.f32 %v503_v34, %v491_v21  ;;  %v500_v44 = vld [vmem:[#allocation2] sm:$0x1] }
  0xeb   : > { %v505_v36 = vadd.f32 %v504_v35, %v492_v30 }
  0xed   : > { %v506_v37 = vadd.f32 %v505_v36, %v493_v15 }
  0xef   : > { %v507_v38 = vadd.f32 %v506_v37, %v494_v27 }
  0xf1   : > { %v508_v39 = vrot.slane %v507_v38, 4 }
  0xf3   : > { %v509_v40 = vadd.f32 %v508_v39, %v507_v38 }
  0xf5   : > { %v510_v41 = vrot.slane %v509_v40, 2 }
  0xf7   : > { %v511_v42 = vadd.f32 %v510_v41, %v509_v40 }
  0xf9   : > { %v512_v43 = vrot.slane %v511_v42, 1 }
  0xfb   : > { %v513_v45 = vadd.f32 %v512_v43, %v511_v42  ;;  %519 = sbr.rel (%p1457_p8) target bundleno = 920 (0x398), region = 64 }
  0xfd   : > { %v514_v46 = vadd.f32 %v513_v45, %v500_v44 }
  0xff   : > { %515 = vst [vmem:[#allocation2] sm:$0x1] %v514_v46 }
 0x100   : > { %v1698_v47 = vld [vmem:[%s2170_s3 + $0x38] sm:$0xff]   ;;  %v1813_v48 = vmov 0.0   ;;  %v1699_v49 = vld [vmem:[%s2170_s3 + $0x30] sm:$0xff]   ;;  %vm1814_vm1 = vmmov 0   ;;  %v1700_v50 = vld [vmem:[%s2170_s3 + $0x28] sm:$0xff]   ;;  %v1815_v4 = vmov 0  }
 0x101   : > { %1624 = vmatprep.subr.bf16.mxu0 %v1813_v48  ;;  %1640 = vmatprep.mubr.msk.bf16.mxu0 %vm1814_vm1, %v1813_v48  ;;  %v1701_v51 = vld [vmem:[%s2170_s3 + $0x20] sm:$0xff]   ;;  %v1709_v53 = vld [vmem:[%s2172_s5 + $0x3c] ss:$24 sps:$4 sm:$0xff]   ;;  %v1711_v54 = vld [vmem:[%s2172_s5 + $0x38] ss:$24 sps:$4 sm:$0xff]  }
 0x102   : > { %1625 = vmatpush3.bf16.msra.mxu0 %v1698_v47  ;;  %v1702_v55 = vld [vmem:[%s2170_s3 + $0x18] sm:$0xff]   ;;  %789 = vmatprep.subr.bf16.mxu1 %v1709_v53  ;;  %v1703_v57 = vld [vmem:[%s2170_s3 + $0x10] sm:$0xff]   ;;  %v1704_v58 = vld [vmem:[%s2170_s3 + $0x8] sm:$0xff]  }
 0x103   : > { %1626 = vmatprep.subr.bf16.mxu0 %v1813_v48  ;;  %790 = vmatpush1.bf16.msra.mxu1 %v1711_v54  ;;  %v1705_v59 = vld [vmem:[%s2170_s3] sm:$0xff]   ;;  %v1708_v60 = vld [vmem:[%s2172_s5 + $0x34] ss:$24 sps:$4 sm:$0xff]   ;;  %v1706_v61 = vld [vmem:[%s2172_s5 + $0x30] ss:$24 sps:$4 sm:$0xff]  }
 0x104   : > { %v1714_v63 = vld [vmem:[%s2172_s5 + $0x4] ss:$24 sps:$4 sm:$0xff]   ;;  %v1712_v1 = vld [vmem:[%s2172_s5] ss:$24 sps:$4 sm:$0xff]   ;;  %809 = vmatprep.mubr.bf16.mxu1 %v1815_v4  ;;  %v1723_v12 = vld [vmem:[%s2172_s5 + $0x14] ss:$24 sps:$4 sm:$0xff]  }
 0x105   : > { %v1715_v0 = vld [vmem:[%s2172_s5 + $0xc] ss:$24 sps:$4 sm:$0xff]   ;;  %v1717_v2 = vld [vmem:[%s2172_s5 + $0x8] ss:$24 sps:$4 sm:$0xff]   ;;  %v1726_v5 = vld [vmem:[%s2174_s7 + $0xf8] sm:$0xff]  }
 0x106   : > { %1627 = vmatpush3.bf16.msra.mxu0 %v1699_v49  ;;  %v520_v52 = vld [vmem:[#allocation2] sm:$0x1]  ;;  %791 = vmatprep.subr.bf16.mxu1 %v1715_v0  ;;  %v1720_v3 = vld [vmem:[%s2172_s5 + $0x44] ss:$24 sps:$4 sm:$0xff]   ;;  %v1730_v15 = vld [vmem:[%s2174_s7 + $0xf0] sm:$0xff]  }
 0x107   : > { %1628 = vmatprep.subr.bf16.mxu0 %v1813_v48  ;;  %v521_v56 = vmul.f32 0.00390625, %v520_v52  ;;  %792 = vmatpush1.bf16.msra.mxu1 %v1717_v2  ;;  %v539_v6 = vld [vmem:[%s2171_s4] sm:$0x1]  ;;  %v1727_v13 = vld [vmem:[%s2174_s7 + $0xb8] sm:$0xff]   ;;  %v1721_v17 = vld [vmem:[%s2172_s5 + $0x10] ss:$24 sps:$4 sm:$0xff]  }
 0x108   : > { %830 = vmatprep.subr.bf16.mxu1 %v1720_v3  ;;  %v1718_v10 = vld [vmem:[%s2172_s5 + $0x40] ss:$24 sps:$4 sm:$0xff]   ;;  %v1731_v19 = vld [vmem:[%s2174_s7 + $0xb0] sm:$0xff]   ;;  %v1734_v20 = vld [vmem:[%s2174_s7 + $0xe8] sm:$0xff]  }
 0x109   : > { %v522_v62 = vpack.c.bf16 %v521_v56, %v521_v56  ;;  %v1724_v18 = vld [vmem:[%s2174_s7 + $0x78] sm:$0xff]   ;;  %v1728_v22 = vld [vmem:[%s2174_s7 + $0x70] sm:$0xff]   ;;  %v1735_v23 = vld [vmem:[%s2174_s7 + $0xa8] sm:$0xff]  }
 0x10a   : > { %1629 = vmatpush3.bf16.msra.mxu0 %v1700_v50  ;;  %v1725_v21 = vld [vmem:[%s2174_s7 + $0x38] sm:$0xff]   ;;  %v1738_v24 = vld [vmem:[%s2174_s7 + $0xe0] sm:$0xff]   ;;  %v1729_v25 = vld [vmem:[%s2174_s7 + $0x30] sm:$0xff]  }
 0x10b   : > { %1630 = vmatprep.subr.bf16.mxu0 %v1813_v48  ;;  %v1732_v26 = vld [vmem:[%s2174_s7 + $0x68] sm:$0xff]   ;;  %v1739_v27 = vld [vmem:[%s2174_s7 + $0xa0] sm:$0xff]   ;;  %v1742_v28 = vld [vmem:[%s2174_s7 + $0xd8] sm:$0xff]  }
 0x10c   : > { %v1733_v29 = vld [vmem:[%s2174_s7 + $0x28] sm:$0xff]   ;;  %v1736_v30 = vld [vmem:[%s2174_s7 + $0x60] sm:$0xff]   ;;  %v1743_v31 = vld [vmem:[%s2174_s7 + $0x98] sm:$0xff]  }
 0x10d   : > { %v1746_v32 = vld [vmem:[%s2174_s7 + $0xd0] sm:$0xff]   ;;  %v1737_v33 = vld [vmem:[%s2174_s7 + $0x20] sm:$0xff]   ;;  %v1740_v34 = vld [vmem:[%s2174_s7 + $0x58] sm:$0xff]  }
 0x10e   : > { %1631 = vmatpush3.bf16.msra.mxu0 %v1701_v51  ;;  %v1747_v35 = vld [vmem:[%s2174_s7 + $0x90] sm:$0xff]   ;;  %v1741_v36 = vld [vmem:[%s2174_s7 + $0x18] sm:$0xff]   ;;  %v1748_v39 = vld [vmem:[%s2174_s7 + $0x48] sm:$0xff]  }
 0x10f   : > { %1632 = vmatprep.subr.bf16.mxu0 %v1813_v48  ;;  %v1744_v37 = vld [vmem:[%s2174_s7 + $0x50] sm:$0xff]   ;;  %v1749_v40 = vld [vmem:[%s2174_s7 + $0x8] sm:$0xff]   ;;  %v1752_v43 = vld [vmem:[%s2174_s7 + $0x40] sm:$0xff]  }
 0x110   : > { %v1745_v38 = vld [vmem:[%s2174_s7 + $0x10] sm:$0xff]   ;;  %v1750_v41 = vld [vmem:[%s2174_s7 + $0xc8] sm:$0xff]   ;;  %v1753_v44 = vld [vmem:[%s2174_s7] sm:$0xff]  }
 0x111   : > { %v1751_v42 = vld [vmem:[%s2174_s7 + $0x88] sm:$0xff]   ;;  %v1754_v45 = vld [vmem:[%s2174_s7 + $0xc0] sm:$0xff]   ;;  %v1756_v47 = vld [vmem:[%s2174_s7 + $0x178] sm:$0xff]  }
 0x112   : > { %1633 = vmatpush3.bf16.msra.mxu0 %v1702_v55  ;;  %v1755_v46 = vld [vmem:[%s2174_s7 + $0x80] sm:$0xff]  }
 0x113   : > { %1634 = vmatprep.subr.bf16.mxu0 %v1813_v48  ;;  %v641_v52 = vld [vmem:[%s2173_s6] sm:$0x3f] }
 0x116   : > { %1635 = vmatpush3.bf16.msra.mxu0 %v1703_v57 }
 0x117   : > { %1636 = vmatprep.subr.bf16.mxu0 %v1813_v48 }
 0x11a   : > { %1637 = vmatpush3.bf16.msra.mxu0 %v1704_v58 }
 0x11b   : > { %1638 = vmatprep.subr.bf16.mxu0 %v1813_v48  ;;  %v703_v48 = vlaneseq }
 0x11d   : > { %v2088_v49 = vshrl.u32 %v703_v48, 7 }
 0x11e   : > { %1639 = vmatpush3.bf16.msra.mxu0 %v1705_v59 }
 0x11f   : > { %748 = vmatprep.subr.bf16.mxu0 %v1708_v60  ;;  %v705_v50 = vsub.s32 0, %v2088_v49  ;;  %v713_v51 = vsub.s32 2, %v2088_v49  ;;  %v709_v53 = vsub.s32 1, %v2088_v49  ;;  %v717_v54 = vsub.s32 3, %v2088_v49 }
 0x120   : > { %v725_v3 = vsub.s32 5, %v2088_v49 }
 0x121   : > { %1641 = vmatmul.mubr.bf16.vlgmr.msra.gmra.mxu0 %v522_v62  ;;  %v706_v55 = vrot.slane %v641_v52, %v705_v50  ;;  %v714_v56 = vrot.slane %v641_v52, %v713_v51  ;;  %v710_v57 = vrot.slane %v641_v52, %v709_v53  ;;  %v718_v58 = vrot.slane %v641_v52, %v717_v54  ;;  %v967_v53 = vld [vmem:[%s2175_s8] sm:$0x1] }
 0x122   : > { %749 = vmatpush1.bf16.msra.mxu0 %v1706_v61  ;;  %768 = vmatprep.mubr.bf16.mxu0 %v1815_v4 }
 0x123   : > { %750 = vmatprep.subr.bf16.mxu0 %v1714_v63 }
 0x126   : > { %751 = vmatpush1.bf16.msra.mxu0 %v1712_v1 }
 0x127   : > { %1568 = vmatprep.subr.bf16.mxu0 %v1726_v5 }
 0x1e1   : > { %v622_v7 = vpop.f32.mrf.mxu0 }
 0x1e2   : > { %v623_v8 = vadd.f32 %v622_v7, %v539_v6 }
 0x1e3   : > { %v1642_v9 = vpop.f32.mrf.mxu0 }
 0x1e4   : > { %v628_v11 = vpack.c.bf16 %v623_v8, %v623_v8 }
 0x1e5   : > { %v625_v14 = vpop.f32.mrf.mxu0 }
 0x1e6   : > { %1478 = vmatmul.mubr.msk.bf16.vlgmr.msra.gmra.mxu0 %vm409_vm0, %v628_v11  ;;  %1479 = vmatmul.mubr.msk.bf16.vlgmr.msra.gmra.mxu1 %vm409_vm0, %v628_v11  ;;  %v726_v14 = vrot.slane %v641_v52, %v725_v3 }
 0x1e7   : > { %v1643_v16 = vpop.f32.mrf.mxu0  ;;  %831 = vmatpush1.bf16.msra.mxu1 %v1718_v10  ;;  %850 = vmatprep.mubr.bf16.mxu1 %v1815_v4 }
 0x1e8   : > { %832 = vmatprep.subr.bf16.mxu1 %v1723_v12  ;;  %1569 = vmatpush3.bf16.msra.mxu0 %v1727_v13 }
 0x1e9   : > { %1570 = vmatprep.subr.bf16.mxu0 %v1730_v15  ;;  %v1757_v15 = vld [vmem:[%s2174_s7 + $0x138] sm:$0xff]  }
 0x1eb   : > { %833 = vmatpush1.bf16.msra.mxu1 %v1721_v17 }
 0x1ec   : > { %1546 = vmatprep.subr.bf16.mxu1 %v1724_v18  ;;  %1571 = vmatpush3.bf16.msra.mxu0 %v1731_v19  ;;  %v1758_v19 = vld [vmem:[%s2174_s7 + $0x170] sm:$0xff]  }
 0x1ed   : > { %1572 = vmatprep.subr.bf16.mxu0 %v1734_v20 }
 0x1ee   : > { %1480 = vmatmul.mubr.msk.bf16.vlgmr.msra.gmra.mxu1 %vm409_vm0, %v628_v11 }
 0x1ef   : > { %1547 = vmatpush3.bf16.msra.mxu1 %v1725_v21 }
 0x1f0   : > { %1548 = vmatprep.subr.bf16.mxu1 %v1728_v22  ;;  %1573 = vmatpush3.bf16.msra.mxu0 %v1735_v23  ;;  %v1759_v22 = vld [vmem:[%s2174_s7 + $0x130] sm:$0xff]  }
 0x1f1   : > { %1574 = vmatprep.subr.bf16.mxu0 %v1738_v24  ;;  %v1760_v24 = vld [vmem:[%s2174_s7 + $0x168] sm:$0xff]  }
 0x1f3   : > { %1549 = vmatpush3.bf16.msra.mxu1 %v1729_v25 }
 0x1f4   : > { %1550 = vmatprep.subr.bf16.mxu1 %v1732_v26  ;;  %1575 = vmatpush3.bf16.msra.mxu0 %v1739_v27 }
 0x1f5   : > { %1576 = vmatprep.subr.bf16.mxu0 %v1742_v28  ;;  %v1761_v28 = vld [vmem:[%s2174_s7 + $0x128] sm:$0xff]  }
 0x1f7   : > { %1551 = vmatpush3.bf16.msra.mxu1 %v1733_v29  ;;  %v1762_v29 = vld [vmem:[%s2174_s7 + $0x160] sm:$0xff]  }
 0x1f8   : > { %1552 = vmatprep.subr.bf16.mxu1 %v1736_v30  ;;  %1577 = vmatpush3.bf16.msra.mxu0 %v1743_v31  ;;  %v1763_v30 = vld [vmem:[%s2174_s7 + $0x120] sm:$0xff]   ;;  %v1764_v31 = vld [vmem:[%s2174_s7 + $0x158] sm:$0xff]  }
 0x1f9   : > { %1578 = vmatprep.subr.bf16.mxu0 %v1746_v32  ;;  %v1765_v32 = vld [vmem:[%s2174_s7 + $0x118] sm:$0xff]  }
 0x1fb   : > { %1553 = vmatpush3.bf16.msra.mxu1 %v1737_v33  ;;  %v721_v33 = vsub.s32 4, %v2088_v49 }
 0x1fc   : > { %1554 = vmatprep.subr.bf16.mxu1 %v1740_v34  ;;  %1579 = vmatpush3.bf16.msra.mxu0 %v1747_v35  ;;  %v1766_v34 = vld [vmem:[%s2174_s7 + $0x150] sm:$0xff]  }
 0x1fd   : > { %1580 = vmatprep.subr.bf16.mxu0 %v1750_v41  ;;  %v1767_v35 = vld [vmem:[%s2174_s7 + $0x110] sm:$0xff]   ;;  %v1771_v41 = vld [vmem:[%s2174_s7 + $0x100] sm:$0xff]  }
 0x1ff   : > { %1555 = vmatpush3.bf16.msra.mxu1 %v1741_v36  ;;  %v722_v36 = vrot.slane %v641_v52, %v721_v33 }
 0x200   : > { %1556 = vmatprep.subr.bf16.mxu1 %v1744_v37  ;;  %1581 = vmatpush3.bf16.msra.mxu0 %v1751_v42  ;;  %v1768_v37 = vld [vmem:[%s2174_s7 + $0x148] sm:$0xff]  }
 0x201   : > { %1582 = vmatprep.subr.bf16.mxu0 %v1754_v45 }
 0x203   : > { %1557 = vmatpush3.bf16.msra.mxu1 %v1745_v38  ;;  %v1769_v38 = vld [vmem:[%s2174_s7 + $0x108] sm:$0xff]  }
 0x204   : > { %1558 = vmatprep.subr.bf16.mxu1 %v1748_v39  ;;  %1583 = vmatpush3.bf16.msra.mxu0 %v1755_v46 }
 0x207   : > { %1559 = vmatpush3.bf16.msra.mxu1 %v1749_v40  ;;  %v1770_v40 = vld [vmem:[%s2174_s7 + $0x140] sm:$0xff]  }
 0x208   : > { %1560 = vmatprep.subr.bf16.mxu1 %v1752_v43 }
 0x20b   : > { %1561 = vmatpush3.bf16.msra.mxu1 %v1753_v44 }
 0x20c   : > { %1590 = vmatprep.subr.bf16.mxu1 %v1756_v47 }
 0x2a6   : > { %v770_v59 = vpop.f32.mrf.mxu0  ;;  %v811_v60 = vpop.f32.mrf.mxu1 }
 0x2a7   : > { %v771_v61 = vadd.f32 %v770_v59, %v706_v55  ;;  %v812_v62 = vadd.f32 %v811_v60, %v714_v56 }
 0x2a8   : > { %v772_v63 = vpop.f32.mrf.mxu0  ;;  %v813_v0 = vpop.f32.mrf.mxu1 }
 0x2a9   : > { %v773_v1 = vadd.f32 %v772_v63, %v710_v57  ;;  %v814_v2 = vadd.f32 %v813_v0, %v718_v58  ;;  %v859_v4 = vmax.f32 %v771_v61, 0.0  ;;  %v861_v5 = vmax.f32 %v812_v62, 0.0 }
 0x2aa   : > { %v774_v6 = vpop.f32.mrf.mxu0  ;;  %v815_v7 = vpop.f32.mrf.mxu1 }
 0x2ab   : > { %v860_v8 = vmax.f32 %v773_v1, 0.0  ;;  %v862_v9 = vmax.f32 %v814_v2, 0.0  ;;  %v865_v16 = vpack.c.bf16 %v859_v4, %v859_v4  ;;  %v867_v17 = vpack.c.bf16 %v861_v5, %v861_v5 }
 0x2ac   : > { %v775_v10 = vpop.f32.mrf.mxu0  ;;  %v816_v11 = vpop.f32.mrf.mxu1 }
 0x2ad   : > { %v866_v12 = vpack.c.bf16 %v860_v8, %v860_v8  ;;  %v868_v13 = vpack.c.bf16 %v862_v9, %v862_v9 }
 0x2ae   : > { %v852_v18 = vpop.f32.mrf.mxu1 }
 0x2af   : > { %1288 = vmatprep.mubr.bf16.mxu1 %v866_v12  ;;  %1328 = vmatprep.mubr.bf16.mxu0 %v868_v13  ;;  %v853_v39 = vadd.f32 %v852_v18, %v722_v36 }
 0x2b0   : > { %v854_v20 = vpop.f32.mrf.mxu1  ;;  %1289 = vmatmul.mubr.bf16.vlgmr.msra.gmra.mxu1 %v865_v16  ;;  %1329 = vmatmul.mubr.bf16.vlgmr.msra.gmra.mxu0 %v867_v17 }
 0x2b1   : > { %v855_v21 = vadd.f32 %v854_v20, %v726_v14  ;;  %1591 = vmatpush3.bf16.msra.mxu1 %v1757_v15  ;;  %v863_v42 = vmax.f32 %v853_v39, 0.0 }
 0x2b2   : > { %v856_v23 = vpop.f32.mrf.mxu1  ;;  %1592 = vmatprep.subr.bf16.mxu1 %v1758_v19 }
 0x2b3   : > { %v864_v25 = vmax.f32 %v855_v21, 0.0  ;;  %v869_v43 = vpack.c.bf16 %v863_v42, %v863_v42 }
 0x2b4   : > { %v857_v26 = vpop.f32.mrf.mxu1 }
 0x2b5   : > { %v870_v27 = vpack.c.bf16 %v864_v25, %v864_v25  ;;  %1593 = vmatpush3.bf16.msra.mxu1 %v1759_v22 }
 0x2b6   : > { %1594 = vmatprep.subr.bf16.mxu1 %v1760_v24 }
 0x2b7   : > { %1368 = vmatprep.mubr.bf16.mxu1 %v870_v27 }
 0x2b9   : > { %1595 = vmatpush3.bf16.msra.mxu1 %v1761_v28 }
 0x2ba   : > { %1596 = vmatprep.subr.bf16.mxu1 %v1762_v29 }
 0x2bd   : > { %1597 = vmatpush3.bf16.msra.mxu1 %v1763_v30 }
 0x2be   : > { %1598 = vmatprep.subr.bf16.mxu1 %v1764_v31 }
 0x2c1   : > { %1599 = vmatpush3.bf16.msra.mxu1 %v1765_v32 }
 0x2c2   : > { %1600 = vmatprep.subr.bf16.mxu1 %v1766_v34 }
 0x2c5   : > { %1601 = vmatpush3.bf16.msra.mxu1 %v1767_v35 }
 0x2c6   : > { %1602 = vmatprep.subr.bf16.mxu1 %v1768_v37 }
 0x2c9   : > { %1603 = vmatpush3.bf16.msra.mxu1 %v1769_v38 }
 0x2ca   : > { %1604 = vmatprep.subr.bf16.mxu1 %v1770_v40 }
 0x2cd   : > { %1605 = vmatpush3.bf16.msra.mxu1 %v1771_v41 }
 0x2d0   : > { %1369 = vmatmul.mubr.bf16.vlgmr.msra.gmra.mxu1 %v869_v43 }
 0x370   : > { %v1562_v44 = vpop.f32.mrf.mxu1  ;;  %v1584_v45 = vpop.f32.mrf.mxu0 }
 0x372   : > { %v1563_v46 = vpop.f32.mrf.mxu1  ;;  %v1585_v47 = vpop.f32.mrf.mxu0 }
 0x373   : > { %v1564_v52 = vadd.f32 %v1563_v46, %v1562_v44  ;;  %v1586_v56 = vadd.f32 %v1585_v47, %v1584_v45 }
 0x374   : > { %v1565_v48 = vpop.f32.mrf.mxu1  ;;  %v1587_v49 = vpop.f32.mrf.mxu0 }
 0x375   : > { %v1291_v54 = vadd.f32 %v1564_v52, %v967_v53 }
 0x376   : > { %v1566_v50 = vpop.f32.mrf.mxu1  ;;  %v1588_v51 = vpop.f32.mrf.mxu0 }
 0x377   : > { %v1331_v58 = vadd.f32 %v1586_v56, %v1291_v54 }
 0x390   : > { %v1606_v55 = vpop.f32.mrf.mxu1 }
 0x392   : > { %v1607_v57 = vpop.f32.mrf.mxu1 }
 0x393   : > { %v1608_v59 = vadd.f32 %v1607_v57, %v1606_v55 }
 0x394   : > { %v1609_v60 = vpop.f32.mrf.mxu1 }
 0x395   : > { %v1371_v61 = vadd.f32 %v1608_v59, %v1331_v58 }
 0x396   : > { %v1610_v62 = vpop.f32.mrf.mxu1 }
 0x397   : > { %1376 = vst [vmem:[%s356_s24] sm:$0x1] %v1371_v61 }
 0x398 PF: > { %s19_s13 = sadd.s32 1, %s1810_s13   ;;  %s2177_s30 = smov %s1802_s11 }
 0x399   : > { %p16_p9 = scmp.ge.s32.totalorder %s19_s13, 10   ;;  %s2178_s10 = smov %s1806_s12 }
 0x39a   : > { %s2179_s11 = smov %s2182_s14  ;;  %s2180_s12 = smov %s2186_s15 }
 0x39b   :  { %18 = sbr.rel (!%p16_p9) target bundleno = 3 (0x3), region = 94 }

</bundles_post_ra>
